<compile_context>
chip_gen: v7x
topology: tpu7x:2x2x1
jax: 0.10.0
libtpu: 0.0.40
codegen_flags: <defaults>
</compile_context>

<pallas_src>
import jax
import jax.numpy as jnp
from jax import lax
from jax.experimental import pallas as pl
from jax.experimental.pallas import tpu as pltpu


def _nsta_stats_kernel(s_ref, t_ref, gram_ref, mom_ref):
    # s_ref / t_ref : (C, D) slab of one batch element (squeezed leading dim).
    # gram_ref      : (3, C, C) accumulator  [K_ss^2, K_tt^2, K_st^2 sums]
    # mom_ref       : (7, D)    accumulator  [Σx, Σx², Σx³, Σy, Σy², Σy³, Σxy]
    b = pl.program_id(1)

    @pl.when(b == 0)
    def _init():
        gram_ref[...] = jnp.zeros_like(gram_ref)
        mom_ref[...] = jnp.zeros_like(mom_ref)

    s = s_ref[...].astype(jnp.float32)
    t = t_ref[...].astype(jnp.float32)

    # F.normalize(x, p=2, dim=-1, eps=1e-12)  ==  x * rsqrt(max(||x||^2, eps^2))
    eps_sq = jnp.float32(1e-24)
    s_inv = lax.rsqrt(jnp.maximum(jnp.sum(s * s, axis=-1, keepdims=True), eps_sq))
    t_inv = lax.rsqrt(jnp.maximum(jnp.sum(t * t, axis=-1, keepdims=True), eps_sq))
    s_n = s * s_inv
    t_n = t * t_inv

    # Gram matrices on the MXU with bf16 operands, f32 accumulation.
    s_b = s_n.astype(jnp.bfloat16)
    t_b = t_n.astype(jnp.bfloat16)
    dn = (((1,), (1,)), ((), ()))  # contract the spatial (D) axis: A @ B.T
    g_ss = lax.dot_general(s_b, s_b, dn, preferred_element_type=jnp.float32)
    g_tt = lax.dot_general(t_b, t_b, dn, preferred_element_type=jnp.float32)
    g_st = lax.dot_general(t_b, s_b, dn, preferred_element_type=jnp.float32)

    gram_ref[0] = gram_ref[0] + g_ss * g_ss
    gram_ref[1] = gram_ref[1] + g_tt * g_tt
    gram_ref[2] = gram_ref[2] + g_st * g_st

    # Raw moments of the normalized maps (reuse powers; reduce only sublanes).
    s2 = s_n * s_n
    s3 = s2 * s_n
    t2 = t_n * t_n
    t3 = t2 * t_n
    st = s_n * t_n
    mom_partial = jnp.concatenate(
        [
            jnp.sum(s_n, axis=0, keepdims=True),
            jnp.sum(s2, axis=0, keepdims=True),
            jnp.sum(s3, axis=0, keepdims=True),
            jnp.sum(t_n, axis=0, keepdims=True),
            jnp.sum(t2, axis=0, keepdims=True),
            jnp.sum(t3, axis=0, keepdims=True),
            jnp.sum(st, axis=0, keepdims=True),
        ],
        axis=0,
    )  # (7, D)
    mom_ref[...] = mom_ref[...] + mom_partial


def nsta_loss(fm_s, fm_t):
    """JAX/Pallas equivalent of NSTa.forward(fm_s, fm_t) for NCHW inputs."""
    assert fm_s.shape == fm_t.shape
    B, C, H, W = fm_s.shape
    D = H * W

    # Keep source dtype for the HBM->VMEM stream; upcast inside the kernel.
    s3 = fm_s.reshape(B, C, D)
    t3 = fm_t.reshape(B, C, D)

    # Leading parallel split (2 TensorCores on v7x; harmless size-1 work split
    # elsewhere / when B is odd).
    G = 2 if (B % 2 == 0 and B >= 2) else 1
    bpg = B // G

    # VMEM budget: 2 inputs x double-buffer + elementwise temporaries + accs.
    in_bytes = C * D * s3.dtype.itemsize
    budget = 4 * in_bytes + 14 * C * D * 4 + 2 * (3 * C * C + 7 * D) * 4 + (4 << 20)
    vmem_limit = int(min(48 << 20, max(budget, 32 << 20)))

    gram_acc, mom_acc = pl.pallas_call(
        _nsta_stats_kernel,
        grid=(G, bpg),
        in_specs=[
            pl.BlockSpec((None, C, D), lambda g, b: (g * bpg + b, 0, 0)),
            pl.BlockSpec((None, C, D), lambda g, b: (g * bpg + b, 0, 0)),
        ],
        out_specs=(
            pl.BlockSpec((None, 3, C, C), lambda g, b: (g, 0, 0, 0)),
            pl.BlockSpec((None, 7, D), lambda g, b: (g, 0, 0)),
        ),
        out_shape=(
            jax.ShapeDtypeStruct((G, 3, C, C), jnp.float32),
            jax.ShapeDtypeStruct((G, 7, D), jnp.float32),
        ),
        compiler_params=pltpu.CompilerParams(
            dimension_semantics=("parallel", "arbitrary"),
            vmem_limit_bytes=vmem_limit,
        ),
    )(s3, t3)

    # Tiny final reductions + scalar algebra in plain JAX.
    gram_sums = jnp.sum(gram_acc, axis=(0, 2, 3))  # [Σ K_ss², Σ K_tt², Σ K_st²]
    moms = jnp.sum(mom_acc, axis=(0, 2))           # [Σx, Σx², Σx³, Σy, Σy², Σy³, Σxy]
    sum_ss, sum_tt, sum_st = gram_sums[0], gram_sums[1], gram_sums[2]
    sx, sx2, sx3 = moms[0], moms[1], moms[2]
    sy, sy2, sy3 = moms[3], moms[4], moms[5]
    sxy = moms[6]

    n = float(B * C * D)

    # Originalloss = 0.5*(mean(K_tt) + mean(K_ss) - 2*mean(K_st)), means over B*C*C.
    original = 0.5 * (sum_tt + sum_ss - 2.0 * sum_st) / float(B * C * C)

    # covariance(): |np.cov(s_flat, t_flat)[0, 1]| with ddof=1.
    mu_x = sx / n
    mu_y = sy / n
    cov = (sxy - n * mu_x * mu_y) / (n - 1.0)
    losscov = jnp.abs(cov)

    # computeSkew(): |pd.Series(s).skew() - pd.Series(t).skew()|  (adjusted
    # Fisher-Pearson: sqrt(n(n-1))/(n-2) * m3 / m2^1.5, biased central moments).
    def _skew(s1, s2_, s3_):
        mu = s1 / n
        m2 = s2_ / n - mu * mu
        m3 = s3_ / n - 3.0 * mu * (s2_ / n) + 2.0 * mu * mu * mu
        return jnp.sqrt(n * (n - 1.0)) / (n - 2.0) * m3 / (m2 ** 1.5)

    loss_skew = jnp.abs(_skew(sx, sx2, sx3) - _skew(sy, sy2, sy3))

    # Modifyloss = Originalloss + 0.25 * losscov + 0.2 * lossSkew
    return original + 0.25 * losscov + 0.2 * loss_skew


if __name__ == "__main__":
    key = jax.random.PRNGKey(0)
    ks, kt = jax.random.split(key)
    B, C, H, W = 2, 8, 16, 16  # small NCHW student & teacher feature maps
    fm_s = jax.random.normal(ks, (B, C, H, W), dtype=jnp.float32)
    fm_t = jax.random.normal(kt, (B, C, H, W), dtype=jnp.float32)

    loss = jax.jit(nsta_loss)(fm_s, fm_t)
    jax.block_until_ready(loss)
    assert loss.shape == () and bool(jnp.isfinite(loss))
    print("KERNEL_OK")
</pallas_src>

<mosaic_0001>
module attributes {stable_mosaic.version = 11 : i64} {
  func.func @_nsta_stats_kernel(%arg0: i32, %arg1: i32, %arg2: memref<1x8x256xf32, #tpu.memory_space<vmem>>, %arg3: memref<1x8x256xf32, #tpu.memory_space<vmem>>, %arg4: memref<1x3x8x8xf32, #tpu.memory_space<vmem>>, %arg5: memref<1x7x256xf32, #tpu.memory_space<vmem>>) attributes {dimension_semantics = [#tpu.dimension_semantics<parallel>, #tpu.dimension_semantics<arbitrary>], iteration_bounds = array<i64: 2, 1>, scalar_prefetch = 0 : i64, scratch_operands = 0 : i64, tpu.core_type = #tpu.core_type<tc>, window_params = [{transform_indices = @transform_0, window_bounds = array<i64: 1, 8, 256>}, {transform_indices = @transform_1, window_bounds = array<i64: 1, 8, 256>}, {transform_indices = @transform_2, window_bounds = array<i64: 1, 3, 8, 8>}, {transform_indices = @transform_3, window_bounds = array<i64: 1, 7, 256>}]} {
    %c0_i32 = arith.constant 0 : i32
    %0 = arith.cmpi eq, %arg1, %c0_i32 : i32
    %1 = arith.extui %0 : i1 to i32
    %c0_i32_0 = arith.constant 0 : i32
    %2 = arith.cmpi ne, %1, %c0_i32_0 : i32
    scf.if %2 {
      %cst_47 = arith.constant 0.000000e+00 : f32
      %75 = vector.broadcast %cst_47 : f32 to vector<3x8x8xf32>
      %c0_48 = arith.constant 0 : index
      %c0_49 = arith.constant 0 : index
      %c0_50 = arith.constant 0 : index
      %c0_51 = arith.constant 0 : index
      %76 = vector.load %arg4[%c0_48, %c0_49, %c0_50, %c0_51] : memref<1x3x8x8xf32, #tpu.memory_space<vmem>>, vector<1x3x8x8xf32>
      %77 = vector.shape_cast %76 : vector<1x3x8x8xf32> to vector<3x8x8xf32>
      %78 = vector.shape_cast %75 : vector<3x8x8xf32> to vector<1x3x8x8xf32>
      tpu.vector_store %arg4[%c0_48, %c0_49, %c0_50, %c0_51], %78 {strides = array<i32>} : memref<1x3x8x8xf32, #tpu.memory_space<vmem>>, vector<1x3x8x8xf32>,
      %cst_52 = arith.constant 0.000000e+00 : f32
      %79 = vector.broadcast %cst_52 : f32 to vector<7x256xf32>
      %c0_53 = arith.constant 0 : index
      %c0_54 = arith.constant 0 : index
      %c0_55 = arith.constant 0 : index
      %80 = vector.load %arg5[%c0_53, %c0_54, %c0_55] : memref<1x7x256xf32, #tpu.memory_space<vmem>>, vector<1x7x256xf32>
      %81 = vector.shape_cast %80 : vector<1x7x256xf32> to vector<7x256xf32>
      %82 = vector.shape_cast %79 : vector<7x256xf32> to vector<1x7x256xf32>
      tpu.vector_store %arg5[%c0_53, %c0_54, %c0_55], %82 {strides = array<i32>} : memref<1x7x256xf32, #tpu.memory_space<vmem>>, vector<1x7x256xf32>,
    } else {
    }
    %c0 = arith.constant 0 : index
    %c0_1 = arith.constant 0 : index
    %c0_2 = arith.constant 0 : index
    %3 = vector.load %arg2[%c0, %c0_1, %c0_2] : memref<1x8x256xf32, #tpu.memory_space<vmem>>, vector<1x8x256xf32>
    %4 = vector.shape_cast %3 : vector<1x8x256xf32> to vector<8x256xf32>
    %c0_3 = arith.constant 0 : index
    %c0_4 = arith.constant 0 : index
    %c0_5 = arith.constant 0 : index
    %5 = vector.load %arg3[%c0_3, %c0_4, %c0_5] : memref<1x8x256xf32, #tpu.memory_space<vmem>>, vector<1x8x256xf32>
    %6 = vector.shape_cast %5 : vector<1x8x256xf32> to vector<8x256xf32>
    %7 = arith.mulf %4, %4 : vector<8x256xf32>
    %cst = arith.constant dense<0.000000e+00> : vector<8xf32>
    %8 = vector.multi_reduction <add>, %7, %cst [1] : vector<8x256xf32> to vector<8xf32>
    %9 = vector.shape_cast %8 : vector<8xf32> to vector<8x1xf32>
    %cst_6 = arith.constant 1.000000e-24 : f32
    %10 = vector.broadcast %cst_6 : f32 to vector<8x1xf32>
    %11 = arith.maximumf %9, %10 : vector<8x1xf32>
    %12 = math.rsqrt %11 : vector<8x1xf32>
    %13 = arith.mulf %6, %6 : vector<8x256xf32>
    %cst_7 = arith.constant dense<0.000000e+00> : vector<8xf32>
    %14 = vector.multi_reduction <add>, %13, %cst_7 [1] : vector<8x256xf32> to vector<8xf32>
    %15 = vector.shape_cast %14 : vector<8xf32> to vector<8x1xf32>
    %cst_8 = arith.constant 1.000000e-24 : f32
    %16 = vector.broadcast %cst_8 : f32 to vector<8x1xf32>
    %17 = arith.maximumf %15, %16 : vector<8x1xf32>
    %18 = math.rsqrt %17 : vector<8x1xf32>
    %19 = vector.broadcast %12 : vector<8x1xf32> to vector<8x256xf32>
    %20 = arith.mulf %4, %19 : vector<8x256xf32>
    %21 = vector.broadcast %18 : vector<8x1xf32> to vector<8x256xf32>
    %22 = arith.mulf %6, %21 : vector<8x256xf32>
    %23 = arith.truncf %20 : vector<8x256xf32> to vector<8x256xbf16>
    %24 = arith.truncf %22 : vector<8x256xf32> to vector<8x256xbf16>
    %cst_9 = arith.constant dense<0.000000e+00> : vector<8x8xf32>
    %25 = tpu.matmul %23, %23, %cst_9 {dimension_numbers = #tpu.dot_dimension_numbers<[1], [1], [0], [0], [0, 0, 1, 0], [], []>} : vector<8x256xbf16>, vector<8x256xbf16>, vector<8x8xf32> -> vector<8x8xf32>
    %cst_10 = arith.constant dense<0.000000e+00> : vector<8x8xf32>
    %26 = tpu.matmul %24, %24, %cst_10 {dimension_numbers = #tpu.dot_dimension_numbers<[1], [1], [0], [0], [0, 0, 1, 0], [], []>} : vector<8x256xbf16>, vector<8x256xbf16>, vector<8x8xf32> -> vector<8x8xf32>
    %cst_11 = arith.constant dense<0.000000e+00> : vector<8x8xf32>
    %27 = tpu.matmul %24, %23, %cst_11 {dimension_numbers = #tpu.dot_dimension_numbers<[1], [1], [0], [0], [0, 0, 1, 0], [], []>} : vector<8x256xbf16>, vector<8x256xbf16>, vector<8x8xf32> -> vector<8x8xf32>
    %c0_12 = arith.constant 0 : index
    %c0_13 = arith.constant 0 : index
    %c0_14 = arith.constant 0 : index
    %c0_15 = arith.constant 0 : index
    %28 = vector.load %arg4[%c0_12, %c0_13, %c0_14, %c0_15] : memref<1x3x8x8xf32, #tpu.memory_space<vmem>>, vector<1x1x8x8xf32>
    %29 = vector.shape_cast %28 : vector<1x1x8x8xf32> to vector<8x8xf32>
    %30 = arith.mulf %25, %25 : vector<8x8xf32>
    %31 = arith.addf %29, %30 : vector<8x8xf32>
    %c0_16 = arith.constant 0 : index
    %c0_17 = arith.constant 0 : index
    %c0_18 = arith.constant 0 : index
    %c0_19 = arith.constant 0 : index
    %32 = vector.load %arg4[%c0_16, %c0_17, %c0_18, %c0_19] : memref<1x3x8x8xf32, #tpu.memory_space<vmem>>, vector<1x1x8x8xf32>
    %33 = vector.shape_cast %32 : vector<1x1x8x8xf32> to vector<8x8xf32>
    %34 = vector.shape_cast %31 : vector<8x8xf32> to vector<1x1x8x8xf32>
    tpu.vector_store %arg4[%c0_16, %c0_17, %c0_18, %c0_19], %34 {strides = array<i32>} : memref<1x3x8x8xf32, #tpu.memory_space<vmem>>, vector<1x1x8x8xf32>,
    %c0_20 = arith.constant 0 : index
    %c1 = arith.constant 1 : index
    %c0_21 = arith.constant 0 : index
    %c0_22 = arith.constant 0 : index
    %35 = vector.load %arg4[%c0_20, %c1, %c0_21, %c0_22] : memref<1x3x8x8xf32, #tpu.memory_space<vmem>>, vector<1x1x8x8xf32>
    %36 = vector.shape_cast %35 : vector<1x1x8x8xf32> to vector<8x8xf32>
    %37 = arith.mulf %26, %26 : vector<8x8xf32>
    %38 = arith.addf %36, %37 : vector<8x8xf32>
    %c0_23 = arith.constant 0 : index
    %c1_24 = arith.constant 1 : index
    %c0_25 = arith.constant 0 : index
    %c0_26 = arith.constant 0 : index
    %39 = vector.load %arg4[%c0_23, %c1_24, %c0_25, %c0_26] : memref<1x3x8x8xf32, #tpu.memory_space<vmem>>, vector<1x1x8x8xf32>
    %40 = vector.shape_cast %39 : vector<1x1x8x8xf32> to vector<8x8xf32>
    %41 = vector.shape_cast %38 : vector<8x8xf32> to vector<1x1x8x8xf32>
    tpu.vector_store %arg4[%c0_23, %c1_24, %c0_25, %c0_26], %41 {strides = array<i32>} : memref<1x3x8x8xf32, #tpu.memory_space<vmem>>, vector<1x1x8x8xf32>,
    %c0_27 = arith.constant 0 : index
    %c2 = arith.constant 2 : index
    %c0_28 = arith.constant 0 : index
    %c0_29 = arith.constant 0 : index
    %42 = vector.load %arg4[%c0_27, %c2, %c0_28, %c0_29] : memref<1x3x8x8xf32, #tpu.memory_space<vmem>>, vector<1x1x8x8xf32>
    %43 = vector.shape_cast %42 : vector<1x1x8x8xf32> to vector<8x8xf32>
    %44 = arith.mulf %27, %27 : vector<8x8xf32>
    %45 = arith.addf %43, %44 : vector<8x8xf32>
    %c0_30 = arith.constant 0 : index
    %c2_31 = arith.constant 2 : index
    %c0_32 = arith.constant 0 : index
    %c0_33 = arith.constant 0 : index
    %46 = vector.load %arg4[%c0_30, %c2_31, %c0_32, %c0_33] : memref<1x3x8x8xf32, #tpu.memory_space<vmem>>, vector<1x1x8x8xf32>
    %47 = vector.shape_cast %46 : vector<1x1x8x8xf32> to vector<8x8xf32>
    %48 = vector.shape_cast %45 : vector<8x8xf32> to vector<1x1x8x8xf32>
    tpu.vector_store %arg4[%c0_30, %c2_31, %c0_32, %c0_33], %48 {strides = array<i32>} : memref<1x3x8x8xf32, #tpu.memory_space<vmem>>, vector<1x1x8x8xf32>,
    %49 = arith.mulf %20, %20 : vector<8x256xf32>
    %50 = arith.mulf %49, %20 : vector<8x256xf32>
    %51 = arith.mulf %22, %22 : vector<8x256xf32>
    %52 = arith.mulf %51, %22 : vector<8x256xf32>
    %53 = arith.mulf %20, %22 : vector<8x256xf32>
    %cst_34 = arith.constant dense<0.000000e+00> : vector<256xf32>
    %54 = vector.multi_reduction <add>, %20, %cst_34 [0] : vector<8x256xf32> to vector<256xf32>
    %55 = vector.shape_cast %54 : vector<256xf32> to vector<1x256xf32>
    %cst_35 = arith.constant dense<0.000000e+00> : vector<256xf32>
    %56 = vector.multi_reduction <add>, %49, %cst_35 [0] : vector<8x256xf32> to vector<256xf32>
    %57 = vector.shape_cast %56 : vector<256xf32> to vector<1x256xf32>
    %cst_36 = arith.constant dense<0.000000e+00> : vector<256xf32>
    %58 = vector.multi_reduction <add>, %50, %cst_36 [0] : vector<8x256xf32> to vector<256xf32>
    %59 = vector.shape_cast %58 : vector<256xf32> to vector<1x256xf32>
    %cst_37 = arith.constant dense<0.000000e+00> : vector<256xf32>
    %60 = vector.multi_reduction <add>, %22, %cst_37 [0] : vector<8x256xf32> to vector<256xf32>
    %61 = vector.shape_cast %60 : vector<256xf32> to vector<1x256xf32>
    %cst_38 = arith.constant dense<0.000000e+00> : vector<256xf32>
    %62 = vector.multi_reduction <add>, %51, %cst_38 [0] : vector<8x256xf32> to vector<256xf32>
    %63 = vector.shape_cast %62 : vector<256xf32> to vector<1x256xf32>
    %cst_39 = arith.constant dense<0.000000e+00> : vector<256xf32>
    %64 = vector.multi_reduction <add>, %52, %cst_39 [0] : vector<8x256xf32> to vector<256xf32>
    %65 = vector.shape_cast %64 : vector<256xf32> to vector<1x256xf32>
    %cst_40 = arith.constant dense<0.000000e+00> : vector<256xf32>
    %66 = vector.multi_reduction <add>, %53, %cst_40 [0] : vector<8x256xf32> to vector<256xf32>
    %67 = vector.shape_cast %66 : vector<256xf32> to vector<1x256xf32>
    %68 = tpu.concatenate %55, %57, %59, %61, %63, %65, %67 in 0 : vector<1x256xf32>, vector<1x256xf32>, vector<1x256xf32>, vector<1x256xf32>, vector<1x256xf32>, vector<1x256xf32>, vector<1x256xf32> -> vector<7x256xf32>
    %c0_41 = arith.constant 0 : index
    %c0_42 = arith.constant 0 : index
    %c0_43 = arith.constant 0 : index
    %69 = vector.load %arg5[%c0_41, %c0_42, %c0_43] : memref<1x7x256xf32, #tpu.memory_space<vmem>>, vector<1x7x256xf32>
    %70 = vector.shape_cast %69 : vector<1x7x256xf32> to vector<7x256xf32>
    %71 = arith.addf %70, %68 : vector<7x256xf32>
    %c0_44 = arith.constant 0 : index
    %c0_45 = arith.constant 0 : index
    %c0_46 = arith.constant 0 : index
    %72 = vector.load %arg5[%c0_44, %c0_45, %c0_46] : memref<1x7x256xf32, #tpu.memory_space<vmem>>, vector<1x7x256xf32>
    %73 = vector.shape_cast %72 : vector<1x7x256xf32> to vector<7x256xf32>
    %74 = vector.shape_cast %71 : vector<7x256xf32> to vector<1x7x256xf32>
    tpu.vector_store %arg5[%c0_44, %c0_45, %c0_46], %74 {strides = array<i32>} : memref<1x7x256xf32, #tpu.memory_space<vmem>>, vector<1x7x256xf32>,
    return
  }
  func.func @transform_0(%arg0: i32, %arg1: i32) -> (i32, i32, i32) {
    %c1_i32 = arith.constant 1 : i32
    %0 = arith.muli %arg0, %c1_i32 : i32
    %1 = arith.addi %0, %arg1 : i32
    %c0_i32 = arith.constant 0 : i32
    %c0_i32_0 = arith.constant 0 : i32
    %c0_i32_1 = arith.constant 0 : i32
    return %1, %c0_i32, %c0_i32_0 : i32, i32, i32
  }
  func.func @transform_1(%arg0: i32, %arg1: i32) -> (i32, i32, i32) {
    %c1_i32 = arith.constant 1 : i32
    %0 = arith.muli %arg0, %c1_i32 : i32
    %1 = arith.addi %0, %arg1 : i32
    %c0_i32 = arith.constant 0 : i32
    %c0_i32_0 = arith.constant 0 : i32
    %c0_i32_1 = arith.constant 0 : i32
    return %1, %c0_i32, %c0_i32_0 : i32, i32, i32
  }
  func.func @transform_2(%arg0: i32, %arg1: i32) -> (i32, i32, i32, i32) {
    %c0_i32 = arith.constant 0 : i32
    %c0_i32_0 = arith.constant 0 : i32
    %c0_i32_1 = arith.constant 0 : i32
    %c0_i32_2 = arith.constant 0 : i32
    return %arg0, %c0_i32, %c0_i32_0, %c0_i32_1 : i32, i32, i32, i32
  }
  func.func @transform_3(%arg0: i32, %arg1: i32) -> (i32, i32, i32) {
    %c0_i32 = arith.constant 0 : i32
    %c0_i32_0 = arith.constant 0 : i32
    %c0_i32_1 = arith.constant 0 : i32
    return %arg0, %c0_i32, %c0_i32_0 : i32, i32, i32
  }
}

</mosaic_0001>

<bundles_post_ra>
// kernel: nsta_loss.1
= control target key start
LH: loop header
LB: loop body
LE: loop exit
PB: predicated region body
PF: predicated region fallthrough
CT: control target
= control target key end

     0   :  { %s724_s12 = smov 0   ;;  %s726_s13 = smov 0   ;;  %s818_s0 = inlined_call_operand.vmem [shape: f32[2,8,256], index: 0, kind: input, shape index: {}]   ;;  %s819_s1 = inlined_call_operand.vmem [shape: f32[2,8,256], index: 1, kind: input, shape index: {}]   ;;  %s820_s2 = inlined_call_operand.vmem [shape: f32[2,3,8,8], index: 2, kind: output, shape index: {0}]   ;;  %s821_s3 = inlined_call_operand.vmem [shape: f32[2,7,256], index: 3, kind: output, shape index: {1}]  }
   0x1   :  { %s728_s14 = smov 0  }
   0x2 LB: > { %s26_s15 = sadd.s32 1, %s697_s13  ;;  %p632_p0 = scmp.ge.s32.totalorder %s701_s14, 1  ;;  %s701_s14 = sphi %s728_s14, %s14_s14   ;;  %s697_s13 = sphi %s726_s13, %s823_s13   ;;  %s693_s12 = sphi %s724_s12, %s822_s12  }
   0x3   : > { %p28_p1 = scmp.ge.s32.totalorder %s26_s15, 2  ;;  %p170_p2 = scmp.lt.s32.totalorder %s701_s14, 3 }
   0x5   : > { %s825_s15 = smov (%p28_p1, %s26_s15), 0  ;;  %p171_p3 = pnand %p632_p0, %p170_p2 }
   0x6   : > { %p207_p4 = scmp.lt.s32.totalorder (!%p171_p3), %s693_s12, 1  ;;  %v703_v0 = vmov (!%p171_p3), 0.0   ;;  %vm235_vm0 = vcmask (!%p171_p3), 64512   ;;  %vm496_vm1 = vcmask (!%p171_p3), 1040384   ;;  %vm499_vm2 = vcmask (!%p171_p3), 1041408  }
   0x7   : > { %174 = sbr.rel (%p171_p3) target bundleno = 430 (0x1ae), region = 28  ;;  %vm502_vm3 = vcmask (!%p171_p3), 1042432   ;;  %vm505_vm4 = vcmask (!%p171_p3), 1043456   ;;  %vm508_vm5 = vcmask (!%p171_p3), 1044480   ;;  %vm511_vm6 = vcmask (!%p171_p3), 1045504  }
   0xe   : > { %s827_s12 = smov (!%p207_p4, %s693_s12), 1 }
   0xf   : > { %s646_s16 = sshll.u32 %s827_s12, 4  ;;  %s649_s26 = smul.u32 24, %s827_s12 }
  0x10   : > { %s211_s19 = scalar_lea.vmem %s818_s0, %s646_s16  ;;  %s748_s22 = scalar_lea.vmem %s821_s3, %s646_s16 }
  0x11   : > { %239 = vst [vmem:[%s748_s22] sm:$0x7f] %v703_v0  ;;  %240 = vst [vmem:[%s748_s22 + $0x8] sm:$0x7f] %v703_v0  ;;  %v241_v1 = vld [vmem:[%s211_s19] sm:$0xff]  ;;  %v242_v2 = vld [vmem:[%s211_s19 + $0x8] sm:$0xff]  ;;  %s218_s25 = scalar_lea.vmem %s819_s1, %s646_s16  ;;  %s758_s29 = scalar_lea.vmem %s820_s2, %s649_s26 }
  0x12   : > { %v245_v3 = vmul.f32 %v241_v1, %v241_v1  ;;  %v246_v4 = vmul.f32 %v242_v2, %v242_v2  ;;  %v243_v5 = vld [vmem:[%s218_s25] sm:$0xff]  ;;  %v244_v6 = vld [vmem:[%s218_s25 + $0x8] sm:$0xff]  ;;  %236 = vst.msk [vmem:[%s758_s29] sm:$0xff] %vm235_vm0, %v703_v0  ;;  %237 = vst.msk [vmem:[%s758_s29 + $0x8] sm:$0xff] %vm235_vm0, %v703_v0 }
  0x13   : > { %v252_v7 = vmul.f32 %v243_v5, %v243_v5  ;;  %v253_v8 = vmul.f32 %v244_v6, %v244_v6  ;;  %238 = vst.msk [vmem:[%s758_s29 + $0x10] sm:$0xff] %vm235_vm0, %v703_v0 }
  0x14   : > { %v247_v9 = vadd.f32 %v246_v4, %v245_v3 }
  0x15   : > { %v254_v10 = vadd.f32 %v253_v8, %v252_v7 }
  0x16   : > { %248 = vadd.xlane.f32.xlu0 %v247_v9 }
  0x1a   : > { %255 = vadd.xlane.f32.xlu0 %v254_v10 }
  0xa3   : > { %v249_v11 = vpop.xlane.xlu0 %248 }
  0xa4   : > { %v250_v12 = vmax.f32 %v249_v11, 1e-24 }
  0xa6   : > { %675 = vrsqrt.f32 %v250_v12 }
  0xa7   : > { %v256_v13 = vpop.xlane.xlu0 %255 }
  0xa8   : > { %v257_v14 = vmax.f32 %v256_v13, 1e-24 }
  0xaa   : > { %677 = vrsqrt.f32 %v257_v14 }
  0xb0   : > { %v676_v15 = vpop.eup %675 }
  0xb1   : > { %v259_v16 = vmul.f32 %v676_v15, %v241_v1  ;;  %v260_v17 = vmul.f32 %v676_v15, %v242_v2 }
  0xb3   : > { %v402_v18 = vmul.f32 %v259_v16, %v259_v16  ;;  %v403_v19 = vmul.f32 %v260_v17, %v260_v17  ;;  %v412_v20 = vrot.slane %v259_v16, 4  ;;  %v418_v21 = vrot.slane %v260_v17, 4 }
  0xb4   : > { %v678_v22 = vpop.eup %677  ;;  %v264_v23 = vpack.c.bf16 %v260_v17, %v260_v17  ;;  %v263_v24 = vpack.c.bf16 %v259_v16, %v259_v16 }
  0xb5   : > { %v404_v25 = vmul.f32 %v402_v18, %v259_v16  ;;  %v405_v26 = vmul.f32 %v403_v19, %v260_v17  ;;  %v413_v27 = vadd.f32 %v412_v20, %v259_v16  ;;  %v419_v28 = vadd.f32 %v418_v21, %v260_v17 }
  0xb6   : > { %v424_v29 = vrot.slane %v402_v18, 4  ;;  %v430_v30 = vrot.slane %v403_v19, 4  ;;  %v766_v31 = vmul.f32 %v678_v22, %v243_v5  ;;  %v768_v32 = vmul.f32 %v678_v22, %v244_v6  ;;  %267 = vmatprep.subr.bf16.mxu0 %v264_v23  ;;  %299 = vmatprep.mubr.bf16.mxu0 %v264_v23 }
  0xb7   : > { %v414_v33 = vrot.slane %v413_v27, 2  ;;  %v420_v34 = vrot.slane %v419_v28, 2  ;;  %v436_v35 = vrot.slane %v404_v25, 4  ;;  %v442_v36 = vrot.slane %v405_v26, 4  ;;  %268 = vmatpush1.bf16.xpose.msra.mxu0 %v263_v24 }
  0xb8   : > { %v425_v37 = vadd.f32 %v424_v29, %v402_v18  ;;  %v431_v38 = vadd.f32 %v430_v30, %v403_v19  ;;  %v406_v39 = vmul.f32 %v766_v31, %v766_v31  ;;  %v407_v40 = vmul.f32 %v768_v32, %v768_v32  ;;  %347 = vmatprep.subr.bf16.mxu0 %v264_v23 }
  0xb9   : > { %v415_v41 = vadd.f32 %v414_v33, %v413_v27  ;;  %v421_v42 = vadd.f32 %v420_v34, %v419_v28  ;;  %v437_v43 = vadd.f32 %v436_v35, %v404_v25  ;;  %v443_v44 = vadd.f32 %v442_v36, %v405_v26 }
  0xba   : > { %v426_v45 = vrot.slane %v425_v37, 2  ;;  %v432_v46 = vrot.slane %v431_v38, 2  ;;  %v408_v47 = vmul.f32 %v406_v39, %v766_v31  ;;  %v409_v48 = vmul.f32 %v407_v40, %v768_v32 }
  0xbb   : > { %v416_v49 = vrot.slane %v415_v41, 1  ;;  %v422_v50 = vrot.slane %v421_v42, 1  ;;  %v438_v51 = vrot.slane %v437_v43, 2  ;;  %v444_v52 = vrot.slane %v443_v44, 2 }
  0xbc   : > { %v427_v53 = vadd.f32 %v426_v45, %v425_v37  ;;  %v433_v54 = vadd.f32 %v432_v46, %v431_v38  ;;  %v410_v55 = vmul.f32 %v766_v31, %v259_v16  ;;  %v411_v56 = vmul.f32 %v768_v32, %v260_v17 }
  0xbd   : > { %v417_v57 = vadd.f32 %v416_v49, %v415_v41  ;;  %v423_v58 = vadd.f32 %v422_v50, %v421_v42  ;;  %v439_v59 = vadd.f32 %v438_v51, %v437_v43  ;;  %v445_v60 = vadd.f32 %v444_v52, %v443_v44 }
  0xbe   : > { %v428_v61 = vrot.slane %v427_v53, 1  ;;  %v434_v62 = vrot.slane %v433_v54, 1  ;;  %v448_v63 = vrot.slane %v766_v31, 4  ;;  %v454_v0 = vrot.slane %v768_v32, 4  ;;  %300 = vmatmul.mubr.bf16.vlgmr.msra.gmra.mrb[0].mxu0 %v263_v24 }
  0xbf   : > { %v440_v1 = vrot.slane %v439_v59, 1  ;;  %v446_v2 = vrot.slane %v445_v60, 1  ;;  %v460_v3 = vrot.slane %v406_v39, 4  ;;  %v466_v4 = vrot.slane %v407_v40, 4  ;;  %348 = vmatpush1.bf16.xpose.msra.mxu0 %v263_v24 }
  0xc0   : > { %v429_v5 = vadd.f32 %v428_v61, %v427_v53  ;;  %v435_v6 = vadd.f32 %v434_v62, %v433_v54  ;;  %v449_v7 = vadd.f32 %v448_v63, %v766_v31  ;;  %v455_v8 = vadd.f32 %v454_v0, %v768_v32  ;;  %v514_v63 = vld [vmem:[%s748_s22] sm:$0x7f]  ;;  %v515_v0 = vld [vmem:[%s748_s22 + $0x8] sm:$0x7f] }
  0xc1   : > { %v441_v9 = vadd.f32 %v440_v1, %v439_v59  ;;  %v447_v10 = vadd.f32 %v446_v2, %v445_v60  ;;  %v461_v11 = vadd.f32 %v460_v3, %v406_v39  ;;  %v467_v12 = vadd.f32 %v466_v4, %v407_v40 }
  0xc2   : > { %v497_v13 = vsel %vm496_vm1, %v417_v57, %v429_v5  ;;  %v498_v14 = vsel %vm496_vm1, %v423_v58, %v435_v6  ;;  %v450_v15 = vrot.slane %v449_v7, 2  ;;  %v456_v16 = vrot.slane %v455_v8, 2 }
  0xc3   : > { %v500_v17 = vsel %vm499_vm2, %v497_v13, %v441_v9  ;;  %v501_v18 = vsel %vm499_vm2, %v498_v14, %v447_v10  ;;  %v462_v19 = vrot.slane %v461_v11, 2  ;;  %v468_v20 = vrot.slane %v467_v12, 2 }
  0xc4   : > { %v451_v21 = vadd.f32 %v450_v15, %v449_v7  ;;  %v457_v22 = vadd.f32 %v456_v16, %v455_v8  ;;  %v472_v23 = vrot.slane %v408_v47, 4  ;;  %v478_v24 = vrot.slane %v409_v48, 4  ;;  %v387_v8 = vld [vmem:[%s758_s29] sm:$0xff]  ;;  %v642_v15 = vld [vmem:[%s758_s29 + $0x10] sm:$0xff] }
  0xc5   : > { %v463_v25 = vadd.f32 %v462_v19, %v461_v11  ;;  %v469_v26 = vadd.f32 %v468_v20, %v467_v12  ;;  %v484_v27 = vrot.slane %v410_v55, 4  ;;  %v490_v28 = vrot.slane %v411_v56, 4 }
  0xc6   : > { %v452_v29 = vrot.slane %v451_v21, 1  ;;  %v458_v30 = vrot.slane %v457_v22, 1  ;;  %v473_v33 = vadd.f32 %v472_v23, %v408_v47  ;;  %v479_v34 = vadd.f32 %v478_v24, %v409_v48 }
  0xc7   : > { %v464_v35 = vrot.slane %v463_v25, 1  ;;  %v470_v36 = vrot.slane %v469_v26, 1  ;;  %v485_v37 = vadd.f32 %v484_v27, %v410_v55  ;;  %v491_v38 = vadd.f32 %v490_v28, %v411_v56 }
  0xc8   : > { %v453_v39 = vadd.f32 %v452_v29, %v451_v21  ;;  %v459_v40 = vadd.f32 %v458_v30, %v457_v22  ;;  %v474_v41 = vrot.slane %v473_v33, 2  ;;  %v480_v42 = vrot.slane %v479_v34, 2  ;;  %v640_v22 = vld [vmem:[%s758_s29 + $0x8] sm:$0xff] }
  0xc9   : > { %v465_v43 = vadd.f32 %v464_v35, %v463_v25  ;;  %v471_v44 = vadd.f32 %v470_v36, %v469_v26  ;;  %v486_v45 = vrot.slane %v485_v37, 2  ;;  %v492_v46 = vrot.slane %v491_v38, 2 }
  0xca   : > { %v475_v49 = vadd.f32 %v474_v41, %v473_v33  ;;  %v481_v50 = vadd.f32 %v480_v42, %v479_v34  ;;  %v503_v51 = vsel %vm502_vm3, %v500_v17, %v453_v39  ;;  %v504_v52 = vsel %vm502_vm3, %v501_v18, %v459_v40 }
  0xcb   : > { %v487_v47 = vadd.f32 %v486_v45, %v485_v37  ;;  %v493_v48 = vadd.f32 %v492_v46, %v491_v38  ;;  %v266_v55 = vpack.c.bf16 %v768_v32, %v768_v32  ;;  %v265_v56 = vpack.c.bf16 %v766_v31, %v766_v31 }
  0xcc   : > { %v476_v53 = vrot.slane %v475_v49, 1  ;;  %v482_v54 = vrot.slane %v481_v50, 1  ;;  %v506_v59 = vsel %vm505_vm4, %v503_v51, %v465_v43  ;;  %v507_v60 = vsel %vm505_vm4, %v504_v52, %v471_v44 }
  0xcd   : > { %v488_v57 = vrot.slane %v487_v47, 1  ;;  %v494_v58 = vrot.slane %v493_v48, 1  ;;  %307 = vmatprep.subr.bf16.mxu1 %v266_v55  ;;  %339 = vmatprep.mubr.bf16.mxu1 %v266_v55 }
  0xce   : > { %v477_v61 = vadd.f32 %v476_v53, %v475_v49  ;;  %v483_v62 = vadd.f32 %v482_v54, %v481_v50  ;;  %308 = vmatpush1.bf16.xpose.msra.mxu1 %v265_v56  ;;  %379 = vmatprep.mubr.bf16.mxu0 %v266_v55 }
  0xcf   : > { %v489_v32 = vadd.f32 %v488_v57, %v487_v47  ;;  %v495_v1 = vadd.f32 %v494_v58, %v493_v48  ;;  %380 = vmatmul.mubr.bf16.vlgmr.msra.gmra.mrb[4].mxu0 %v265_v56 }
  0xd0   : > { %v509_v31 = vsel %vm508_vm5, %v506_v59, %v477_v61  ;;  %v510_v2 = vsel %vm508_vm5, %v507_v60, %v483_v62 }
  0xd1   : > { %v512_v3 = vsel %vm511_vm6, %v509_v31, %v489_v32  ;;  %v513_v4 = vsel %vm511_vm6, %v510_v2, %v495_v1 }
  0xd2   : > { %v516_v5 = vadd.f32 %v514_v63, %v512_v3  ;;  %v517_v6 = vadd.f32 %v515_v0, %v513_v4 }
  0xd4   : > { %518 = vst [vmem:[%s748_s22] sm:$0x7f] %v516_v5  ;;  %519 = vst [vmem:[%s748_s22 + $0x8] sm:$0x7f] %v517_v6 }
  0xd5   : > { %340 = vmatmul.mubr.bf16.vlgmr.msra.gmra.mrb[0].mxu1 %v265_v56 }
 0x191   : > { %v301_v7 = vpop.f32.mrb[0].mxu0 }
 0x192   : > { %v388_v9 = vmul.f32 %v301_v7, %v301_v7  ;;  %v303_v10 = vpop.f32.mrb[1].mxu0 }
 0x193   : > { %v304_v11 = vpop.f32.mrb[2].mxu0 }
 0x194   : > { %v389_v12 = vadd.f32 %v388_v9, %v387_v8  ;;  %v305_v13 = vpop.f32.mrb[3].mxu0 }
 0x196   : > { %391 = vst.msk [vmem:[%s758_s29] sm:$0xff] %vm235_vm0, %v389_v12 }
 0x1a2   : > { %v381_v14 = vpop.f32.mrb[4].mxu0 }
 0x1a3   : > { %v399_v16 = vmul.f32 %v381_v14, %v381_v14  ;;  %v383_v17 = vpop.f32.mrb[5].mxu0 }
 0x1a4   : > { %v384_v18 = vpop.f32.mrb[6].mxu0 }
 0x1a5   : > { %v400_v19 = vadd.f32 %v642_v15, %v399_v16  ;;  %v385_v20 = vpop.f32.mrb[7].mxu0 }
 0x1a7   : > { %643 = vst.msk [vmem:[%s758_s29 + $0x10] sm:$0xff] %vm235_vm0, %v400_v19 }
 0x1a8   : > { %v341_v21 = vpop.f32.mrb[0].mxu1 }
 0x1a9   : > { %v394_v23 = vmul.f32 %v341_v21, %v341_v21  ;;  %v343_v24 = vpop.f32.mrb[1].mxu1 }
 0x1aa   : > { %v344_v25 = vpop.f32.mrb[2].mxu1 }
 0x1ab   : > { %v395_v26 = vadd.f32 %v640_v22, %v394_v23  ;;  %v345_v27 = vpop.f32.mrb[3].mxu1 }
 0x1ad   : > { %641 = vst.msk [vmem:[%s758_s29 + $0x8] sm:$0xff] %vm235_vm0, %v395_v26 }
 0x1ae PF: > { %s14_s14 = sadd.s32 1, %s701_s14   ;;  %s822_s12 = smov %s697_s13 }
 0x1af   : > { %p11_p5 = scmp.ge.s32.totalorder %s14_s14, 4   ;;  %s823_s13 = smov %s825_s15 }
 0x1b1   :  { %13 = sbr.rel (!%p11_p5) target bundleno = 2 (0x2), region = 79 }

</bundles_post_ra>
